<compile_context>
chip_gen: v6e
topology: v6e:2x2x1
jax: 0.10.0
libtpu: 0.0.40
codegen_flags: <defaults>
</compile_context>

<pallas_src>
import math

import jax
import jax.numpy as jnp
from jax.experimental import pallas as pl
from jax.experimental.pallas import tpu as pltpu


def rnn_kernel(x_ref, wx_ref, wh_ref, b_ref, fcw_ref, out_ref):
    T = x_ref.shape[0]
    H = wh_ref.shape[0]

    # Hoisted input projection for ALL timesteps: one MXU matmul, bias added
    # once.  (T, E) @ (E, H) -> (T, H)
    xproj = jnp.dot(x_ref[...], wx_ref[...],
                    preferred_element_type=jnp.float32) + b_ref[...]

    wh = wh_ref[...]
    h = jnp.zeros((1, H), dtype=jnp.float32)

    # Fully unrolled recurrence (T is a small static trip count); h stays in
    # registers across steps.
    for t in range(T):
        h = jnp.tanh(xproj[t:t + 1, :] +
                     jnp.dot(h, wh, preferred_element_type=jnp.float32))

    # fc(rnn_out[-1].view(1, -1)) -> (1, C)
    out_ref[...] = jnp.dot(h, fcw_ref[...],
                           preferred_element_type=jnp.float32)


def rnn_native_forward(x, wx, wh, b, fcw):
    """x: [T, E] embedded sequence. Returns [1, C] logits."""
    T, E = x.shape
    H = wh.shape[0]
    C = fcw.shape[1]
    b2d = b.reshape(1, H)
    return pl.pallas_call(
        rnn_kernel,
        out_shape=jax.ShapeDtypeStruct((1, C), jnp.float32),
        grid=(1,),
        in_specs=[
            pl.BlockSpec((T, E), lambda i: (0, 0)),   # embedded tokens
            pl.BlockSpec((E, H), lambda i: (0, 0)),   # Wx
            pl.BlockSpec((H, H), lambda i: (0, 0)),   # Wh
            pl.BlockSpec((1, H), lambda i: (0, 0)),   # bias
            pl.BlockSpec((H, C), lambda i: (0, 0)),   # fc weight (transposed)
        ],
        out_specs=pl.BlockSpec((1, C), lambda i: (0, 0)),
        compiler_params=pltpu.CompilerParams(
            dimension_semantics=("arbitrary",)),
    )(x, wx, wh, b2d, fcw)


def reference_forward(seq, emb, wx, wh, b, fcw):
    """Pure-JAX mirror of the PyTorch RNNNativeModel forward."""
    x = emb[seq]                               # [T, E]
    H = wh.shape[0]
    h = jnp.zeros((1, H), jnp.float32)
    for t in range(x.shape[0]):
        h = jnp.tanh(x[t] @ wx + h @ wh + b)   # [H] + [1,H] + [H] -> [1,H]
    return h @ fcw                             # [1, C]


if __name__ == "__main__":
    # Small shapes consistent with the module.
    VOCAB, E, H, C, T, PAD = 50, 32, 32, 4, 8, 0

    key = jax.random.PRNGKey(0)
    k_wx, k_wh, k_emb, k_fc, k_seq = jax.random.split(key, 5)
    bound = 1.0 / math.sqrt(H)

    wx = jax.random.uniform(k_wx, (E, H), jnp.float32, -bound, bound)
    wh = jax.random.uniform(k_wh, (H, H), jnp.float32, -bound, bound)
    b = jnp.zeros((H,), jnp.float32)
    emb = jax.random.normal(k_emb, (VOCAB, E), jnp.float32).at[PAD].set(0.0)
    fcw = jax.random.uniform(k_fc, (H, C), jnp.float32, -bound, bound)

    seq = jax.random.randint(k_seq, (T,), 0, VOCAB, dtype=jnp.int32)

    # Glue: embedding lookup (padding_idx row is zero) done as an XLA gather.
    x = emb[seq]                               # [T, E]

    out = rnn_native_forward(x, wx, wh, b, fcw)
    out = jax.block_until_ready(out)

    ref = reference_forward(seq, emb, wx, wh, b, fcw)
    assert out.shape == (1, C)
    assert jnp.allclose(out, ref, atol=1e-4, rtol=1e-4), (out, ref)

    print("KERNEL_OK")
</pallas_src>

<mosaic_0001>
module attributes {stable_mosaic.version = 11 : i64} {
  func.func @rnn_kernel(%arg0: i32, %arg1: memref<8x32xf32, #tpu.memory_space<vmem>>, %arg2: memref<32x32xf32, #tpu.memory_space<vmem>>, %arg3: memref<32x32xf32, #tpu.memory_space<vmem>>, %arg4: memref<1x32xf32, #tpu.memory_space<vmem>>, %arg5: memref<32x4xf32, #tpu.memory_space<vmem>>, %arg6: memref<1x4xf32, #tpu.memory_space<vmem>>) attributes {dimension_semantics = [#tpu.dimension_semantics<arbitrary>], iteration_bounds = array<i64: 1>, scalar_prefetch = 0 : i64, scratch_operands = 0 : i64, tpu.core_type = #tpu.core_type<tc>, window_params = [{pipeline_mode = #tpu.pipeline_mode<synchronous>, transform_indices = @transform_0, window_bounds = array<i64: 8, 32>}, {pipeline_mode = #tpu.pipeline_mode<synchronous>, transform_indices = @transform_1, window_bounds = array<i64: 32, 32>}, {pipeline_mode = #tpu.pipeline_mode<synchronous>, transform_indices = @transform_2, window_bounds = array<i64: 32, 32>}, {pipeline_mode = #tpu.pipeline_mode<synchronous>, transform_indices = @transform_3, window_bounds = array<i64: 1, 32>}, {pipeline_mode = #tpu.pipeline_mode<synchronous>, transform_indices = @transform_4, window_bounds = array<i64: 32, 4>}, {pipeline_mode = #tpu.pipeline_mode<synchronous>, transform_indices = @transform_5, window_bounds = array<i64: 1, 4>}]} {
    %c0 = arith.constant 0 : index
    %c0_0 = arith.constant 0 : index
    %0 = vector.load %arg1[%c0, %c0_0] : memref<8x32xf32, #tpu.memory_space<vmem>>, vector<8x32xf32>
    %c0_1 = arith.constant 0 : index
    %c0_2 = arith.constant 0 : index
    %1 = vector.load %arg2[%c0_1, %c0_2] : memref<32x32xf32, #tpu.memory_space<vmem>>, vector<32x32xf32>
    %cst = arith.constant dense<0.000000e+00> : vector<8x32xf32>
    %2 = tpu.matmul %0, %1, %cst {dimension_numbers = #tpu.dot_dimension_numbers<[1], [0], [0], [1], [0, 0, 1, 1], [], []>} : vector<8x32xf32>, vector<32x32xf32>, vector<8x32xf32> -> vector<8x32xf32>
    %c0_3 = arith.constant 0 : index
    %c0_4 = arith.constant 0 : index
    %3 = vector.load %arg4[%c0_3, %c0_4] : memref<1x32xf32, #tpu.memory_space<vmem>>, vector<1x32xf32>
    %4 = vector.broadcast %3 : vector<1x32xf32> to vector<8x32xf32>
    %5 = arith.addf %2, %4 : vector<8x32xf32>
    %c0_5 = arith.constant 0 : index
    %c0_6 = arith.constant 0 : index
    %6 = vector.load %arg3[%c0_5, %c0_6] : memref<32x32xf32, #tpu.memory_space<vmem>>, vector<32x32xf32>
    %cst_7 = arith.constant 0.000000e+00 : f32
    %7 = vector.broadcast %cst_7 : f32 to vector<1x32xf32>
    %8 = vector.extract_strided_slice %5 {offsets = [0, 0], sizes = [1, 32], strides = [1, 1]} : vector<8x32xf32> to vector<1x32xf32>
    %cst_8 = arith.constant dense<0.000000e+00> : vector<1x32xf32>
    %9 = tpu.matmul %7, %6, %cst_8 {dimension_numbers = #tpu.dot_dimension_numbers<[1], [0], [0], [1], [0, 0, 1, 1], [], []>} : vector<1x32xf32>, vector<32x32xf32>, vector<1x32xf32> -> vector<1x32xf32>
    %10 = arith.addf %8, %9 : vector<1x32xf32>
    %11 = math.tanh %10 : vector<1x32xf32>
    %12 = vector.extract_strided_slice %5 {offsets = [1, 0], sizes = [1, 32], strides = [1, 1]} : vector<8x32xf32> to vector<1x32xf32>
    %cst_9 = arith.constant dense<0.000000e+00> : vector<1x32xf32>
    %13 = tpu.matmul %11, %6, %cst_9 {dimension_numbers = #tpu.dot_dimension_numbers<[1], [0], [0], [1], [0, 0, 1, 1], [], []>} : vector<1x32xf32>, vector<32x32xf32>, vector<1x32xf32> -> vector<1x32xf32>
    %14 = arith.addf %12, %13 : vector<1x32xf32>
    %15 = math.tanh %14 : vector<1x32xf32>
    %16 = vector.extract_strided_slice %5 {offsets = [2, 0], sizes = [1, 32], strides = [1, 1]} : vector<8x32xf32> to vector<1x32xf32>
    %cst_10 = arith.constant dense<0.000000e+00> : vector<1x32xf32>
    %17 = tpu.matmul %15, %6, %cst_10 {dimension_numbers = #tpu.dot_dimension_numbers<[1], [0], [0], [1], [0, 0, 1, 1], [], []>} : vector<1x32xf32>, vector<32x32xf32>, vector<1x32xf32> -> vector<1x32xf32>
    %18 = arith.addf %16, %17 : vector<1x32xf32>
    %19 = math.tanh %18 : vector<1x32xf32>
    %20 = vector.extract_strided_slice %5 {offsets = [3, 0], sizes = [1, 32], strides = [1, 1]} : vector<8x32xf32> to vector<1x32xf32>
    %cst_11 = arith.constant dense<0.000000e+00> : vector<1x32xf32>
    %21 = tpu.matmul %19, %6, %cst_11 {dimension_numbers = #tpu.dot_dimension_numbers<[1], [0], [0], [1], [0, 0, 1, 1], [], []>} : vector<1x32xf32>, vector<32x32xf32>, vector<1x32xf32> -> vector<1x32xf32>
    %22 = arith.addf %20, %21 : vector<1x32xf32>
    %23 = math.tanh %22 : vector<1x32xf32>
    %24 = vector.extract_strided_slice %5 {offsets = [4, 0], sizes = [1, 32], strides = [1, 1]} : vector<8x32xf32> to vector<1x32xf32>
    %cst_12 = arith.constant dense<0.000000e+00> : vector<1x32xf32>
    %25 = tpu.matmul %23, %6, %cst_12 {dimension_numbers = #tpu.dot_dimension_numbers<[1], [0], [0], [1], [0, 0, 1, 1], [], []>} : vector<1x32xf32>, vector<32x32xf32>, vector<1x32xf32> -> vector<1x32xf32>
    %26 = arith.addf %24, %25 : vector<1x32xf32>
    %27 = math.tanh %26 : vector<1x32xf32>
    %28 = vector.extract_strided_slice %5 {offsets = [5, 0], sizes = [1, 32], strides = [1, 1]} : vector<8x32xf32> to vector<1x32xf32>
    %cst_13 = arith.constant dense<0.000000e+00> : vector<1x32xf32>
    %29 = tpu.matmul %27, %6, %cst_13 {dimension_numbers = #tpu.dot_dimension_numbers<[1], [0], [0], [1], [0, 0, 1, 1], [], []>} : vector<1x32xf32>, vector<32x32xf32>, vector<1x32xf32> -> vector<1x32xf32>
    %30 = arith.addf %28, %29 : vector<1x32xf32>
    %31 = math.tanh %30 : vector<1x32xf32>
    %32 = vector.extract_strided_slice %5 {offsets = [6, 0], sizes = [1, 32], strides = [1, 1]} : vector<8x32xf32> to vector<1x32xf32>
    %cst_14 = arith.constant dense<0.000000e+00> : vector<1x32xf32>
    %33 = tpu.matmul %31, %6, %cst_14 {dimension_numbers = #tpu.dot_dimension_numbers<[1], [0], [0], [1], [0, 0, 1, 1], [], []>} : vector<1x32xf32>, vector<32x32xf32>, vector<1x32xf32> -> vector<1x32xf32>
    %34 = arith.addf %32, %33 : vector<1x32xf32>
    %35 = math.tanh %34 : vector<1x32xf32>
    %36 = vector.extract_strided_slice %5 {offsets = [7, 0], sizes = [1, 32], strides = [1, 1]} : vector<8x32xf32> to vector<1x32xf32>
    %cst_15 = arith.constant dense<0.000000e+00> : vector<1x32xf32>
    %37 = tpu.matmul %35, %6, %cst_15 {dimension_numbers = #tpu.dot_dimension_numbers<[1], [0], [0], [1], [0, 0, 1, 1], [], []>} : vector<1x32xf32>, vector<32x32xf32>, vector<1x32xf32> -> vector<1x32xf32>
    %38 = arith.addf %36, %37 : vector<1x32xf32>
    %39 = math.tanh %38 : vector<1x32xf32>
    %c0_16 = arith.constant 0 : index
    %c0_17 = arith.constant 0 : index
    %40 = vector.load %arg5[%c0_16, %c0_17] : memref<32x4xf32, #tpu.memory_space<vmem>>, vector<32x4xf32>
    %cst_18 = arith.constant dense<0.000000e+00> : vector<1x4xf32>
    %41 = tpu.matmul %39, %40, %cst_18 {dimension_numbers = #tpu.dot_dimension_numbers<[1], [0], [0], [1], [0, 0, 1, 1], [], []>} : vector<1x32xf32>, vector<32x4xf32>, vector<1x4xf32> -> vector<1x4xf32>
    %c0_19 = arith.constant 0 : index
    %c0_20 = arith.constant 0 : index
    %42 = vector.load %arg6[%c0_19, %c0_20] : memref<1x4xf32, #tpu.memory_space<vmem>>, vector<1x4xf32>
    tpu.vector_store %arg6[%c0_19, %c0_20], %41 {strides = array<i32>} : memref<1x4xf32, #tpu.memory_space<vmem>>, vector<1x4xf32>,
    return
  }
  func.func @transform_0(%arg0: i32) -> (i32, i32) {
    %c0_i32 = arith.constant 0 : i32
    %c0_i32_0 = arith.constant 0 : i32
    %c0_i32_1 = arith.constant 0 : i32
    return %c0_i32, %c0_i32_0 : i32, i32
  }
  func.func @transform_1(%arg0: i32) -> (i32, i32) {
    %c0_i32 = arith.constant 0 : i32
    %c0_i32_0 = arith.constant 0 : i32
    %c0_i32_1 = arith.constant 0 : i32
    return %c0_i32, %c0_i32_0 : i32, i32
  }
  func.func @transform_2(%arg0: i32) -> (i32, i32) {
    %c0_i32 = arith.constant 0 : i32
    %c0_i32_0 = arith.constant 0 : i32
    %c0_i32_1 = arith.constant 0 : i32
    return %c0_i32, %c0_i32_0 : i32, i32
  }
  func.func @transform_3(%arg0: i32) -> (i32, i32) {
    %c0_i32 = arith.constant 0 : i32
    %c0_i32_0 = arith.constant 0 : i32
    %c0_i32_1 = arith.constant 0 : i32
    return %c0_i32, %c0_i32_0 : i32, i32
  }
  func.func @transform_4(%arg0: i32) -> (i32, i32) {
    %c0_i32 = arith.constant 0 : i32
    %c0_i32_0 = arith.constant 0 : i32
    %c0_i32_1 = arith.constant 0 : i32
    return %c0_i32, %c0_i32_0 : i32, i32
  }
  func.func @transform_5(%arg0: i32) -> (i32, i32) {
    %c0_i32 = arith.constant 0 : i32
    %c0_i32_0 = arith.constant 0 : i32
    %c0_i32_1 = arith.constant 0 : i32
    return %c0_i32, %c0_i32_0 : i32, i32
  }
}

</mosaic_0001>

<bundles_post_ra>
// kernel: tpu_custom_call.1
= control target key start
LH: loop header
LB: loop body
LE: loop exit
PB: predicated region body
PF: predicated region fallthrough
CT: control target
= control target key end

     0   :  { %10 = vsyncpa [#allocation3], 0  ;;  %s1312_s0 = inlined_call_operand.hbm [shape: f32[8,32], index: 0, kind: input, shape index: {}]   ;;  %s1313_s1 = inlined_call_operand.vmem [shape: f32[32,32], index: 1, kind: input, shape index: {}]   ;;  %s1314_s2 = inlined_call_operand.hbm [shape: f32[32,32], index: 2, kind: input, shape index: {}]   ;;  %s1315_s3 = inlined_call_operand.vmem [shape: f32[1,32], index: 3, kind: input, shape index: {}]   ;;  %s1316_s4 = inlined_call_operand.vmem [shape: f32[32,4], index: 4, kind: input, shape index: {}]   ;;  %s1317_s5 = inlined_call_operand.hbm [shape: f32[1,4], index: 5, kind: output, shape index: {}]  }
   0x1   :  { %11 = vsyncpa [#allocation6], 0 }
   0x2   :  { %12 = vsyncpa [#allocation4], 0  ;;  %s1119_s18 = smov [#allocation2]   ;;  %s1120_s20 = smov [#allocation5]  }
   0x3   :  { %s19_s19 = sshll.u32 %s1119_s18, 4  ;;  %s30_s21 = sshll.u32 %s1120_s20, 4  ;;  %s20_s19 = int_to_ptr.vmem [resolvable:$true] %s19_s19  ;;  %s31_s21 = int_to_ptr.vmem [resolvable:$true] %s30_s21 }
   0x4   :  { %s1061_s22 = scalar_lea.vmem %s20_s19, 128  ;;  %p1066_p1 = scmp.lt.s32.totalorder %s20_s19, %s20_s19 }
   0x5   :  { %p1062_p0 = scmp.ne.s32.totalorder %s20_s19, %s1061_s22  ;;  %p1067_p2 = scmp.lt.s32.totalorder %s1061_s22, %s1061_s22 }
   0x7   :  { %p1068_p3 = por %p1067_p2, %p1066_p1 }
   0x9   :  { %p1069_p4 = pnand %p1068_p3, %p1062_p0 }
   0xb   :  { %1072 = shalt.err (!%p1069_p4)
}
   0xc   :  { %22 = dma.hbm_to_vmem [thread:$0]  %s1312_s0, 128, %s20_s19, [#allocation3]  }
   0xd   :  { %s1081_s25 = scalar_lea.vmem %s31_s21, 512  ;;  %p1086_p6 = scmp.lt.s32.totalorder %s31_s21, %s31_s21 }
   0xe   :  { %p1082_p5 = scmp.ne.s32.totalorder %s31_s21, %s1081_s25  ;;  %p1087_p7 = scmp.lt.s32.totalorder %s1081_s25, %s1081_s25 }
  0x10   :  { %p1088_p8 = por %p1087_p7, %p1086_p6 }
  0x12   :  { %p1089_p9 = pnand %p1088_p8, %p1082_p5 }
  0x14   :  { %1092 = shalt.err (!%p1089_p9)
}
  0x15   :  { %s1121_s26 = smov 128   ;;  %s1122_s27 = smov 8  }
  0x16   :  { %36 = dma.hbm_to_vmem [thread:$0]  %s1314_s2, 512, %s31_s21, [#allocation6], %s1121_s26, %s1121_s26, %s1122_s27  }
  0x17   :  { %1113 = dma.done.wait [#allocation3], 128  }
  0x18   :  { %1114 = vsyncadd [#allocation3], 4294967168 }
  0x19   :  { %1115 = dma.done.wait [#allocation6], 512  }
  0x1a   :  { %1116 = vsyncadd [#allocation6], 4294966784  ;;  %v1123_v0 = vmov 0.0   ;;  %vm1124_vm0 = vmmov 0   ;;  %v51_v1 = vld [vmem:[%s1313_s1 + $0x18] sm:$0xff]  ;;  %v1171_v2 = vld [vmem:[#allocation5 + $0x18] sm:$0xff] }
  0x1b   :  { %920 = vmatprep.subr.mxu0 %v1123_v0  ;;  %931 = vmatprep.subr.mxu1 %v1123_v0  ;;  %v50_v3 = vld [vmem:[%s1313_s1 + $0x10] sm:$0xff]  ;;  %v1177_v4 = vld [vmem:[#allocation5 + $0x10] sm:$0xff]  ;;  %v49_v5 = vld [vmem:[%s1313_s1 + $0x8] sm:$0xff]  ;;  %vm59_vm1 = vcmask 261120   ;;  %s1125_s19 = smov [#allocation7]   ;;  %vm842_vm2 = vcmask 24576  }
  0x1c   :  { %928 = vmatprep.mubr.msk.f32.mxu0 %vm1124_vm0, %v1123_v0  ;;  %939 = vmatprep.mubr.msk.f32.mxu1 %vm1124_vm0, %v1123_v0  ;;  %v1184_v6 = vld [vmem:[#allocation5 + $0x8] sm:$0xff]  ;;  %v48_v7 = vld [vmem:[%s1313_s1] sm:$0xff]  ;;  %v1192_v8 = vld [vmem:[#allocation5] sm:$0xff]  ;;  %s850_s20 = sshll.u32 %s1125_s19, 4  ;;  %s851_s20 = int_to_ptr.vmem [resolvable:$true] %s850_s20 }
  0x1d   :  { %921 = vmatpush3.msra.mxu0 %v51_v1  ;;  %932 = vmatpush3.msra.mxu1 %v1171_v2  ;;  %v47_v9 = vld [vmem:[#allocation2] sm:$0xff]  ;;  %v767_v54 = vld [vmem:[%s1316_s4 + $0x18] sm:$0xff]  ;;  %v766_v55 = vld [vmem:[%s1316_s4 + $0x10] sm:$0xff]  ;;  %s1093_s21 = scalar_lea.vmem %s851_s20, 16  ;;  %p1098_p11 = scmp.lt.s32.totalorder %s851_s20, %s851_s20 }
  0x1e   :  { %922 = vmatprep.subr.mxu0 %v1123_v0  ;;  %933 = vmatprep.subr.mxu1 %v1123_v0  ;;  %v860_v10 = vld [vmem:[%s1315_s3] ss:$0 sm:$0xff]  ;;  %v765_v56 = vld [vmem:[%s1316_s4 + $0x8] sm:$0xff]  ;;  %p1094_p10 = scmp.ne.s32.totalorder %s851_s20, %s1093_s21 }
  0x1f   :  { %923 = vmatpush3.msra.mxu0 %v50_v3  ;;  %934 = vmatpush3.msra.mxu1 %v1177_v4  ;;  %v764_v57 = vld [vmem:[%s1316_s4] sm:$0xff]  ;;  %s1097_s4 = scalar_lea.vmem %s851_s20, 32 }
  0x20   :  { %924 = vmatprep.subr.mxu0 %v1123_v0  ;;  %935 = vmatprep.subr.mxu1 %v1123_v0  ;;  %p1099_p12 = scmp.lt.s32.totalorder %s1097_s4, %s1093_s21 }
  0x21   :  { %925 = vmatpush3.msra.mxu0 %v49_v5  ;;  %936 = vmatpush3.msra.mxu1 %v1184_v6 }
  0x22   :  { %926 = vmatprep.subr.mxu0 %v1123_v0  ;;  %937 = vmatprep.subr.mxu1 %v1123_v0  ;;  %p1100_p13 = por %p1099_p12, %p1098_p11 }
  0x23   :  { %927 = vmatpush3.msra.mxu0 %v48_v7  ;;  %938 = vmatpush3.msra.mxu1 %v1192_v8 }
  0x24   :  { %929 = vmatmul.mubr.msk.f32.vlgmr.msra.gmra.mxu0 %vm59_vm1, %v47_v9  ;;  %940 = vmatmul.mubr.f32.vlgmr.msra.gmra.mxu1 %v1123_v0  ;;  %p1101_p0 = pnand %p1100_p13, %p1094_p10 }
  0x25   :  { %942 = vmatprep.subr.mxu0 %v1123_v0  ;;  %950 = vmatprep.mubr.msk.f32.mxu0 %vm1124_vm0, %v1123_v0 }
  0x26   :  { %943 = vmatpush3.msra.mxu0 %v1171_v2  ;;  %953 = vmatprep.subr.mxu1 %v1123_v0 }
  0x27   :  { %944 = vmatprep.subr.mxu0 %v1123_v0  ;;  %954 = vmatpush3.msra.mxu1 %v1171_v2 }
  0x28   :  { %945 = vmatpush3.msra.mxu0 %v1177_v4  ;;  %955 = vmatprep.subr.mxu1 %v1123_v0 }
  0x29   :  { %946 = vmatprep.subr.mxu0 %v1123_v0  ;;  %956 = vmatpush3.msra.mxu1 %v1177_v4 }
  0x2a   :  { %947 = vmatpush3.msra.mxu0 %v1184_v6  ;;  %957 = vmatprep.subr.mxu1 %v1123_v0 }
  0x2b   :  { %948 = vmatprep.subr.mxu0 %v1123_v0  ;;  %958 = vmatpush3.msra.mxu1 %v1184_v6 }
  0x2c   :  { %949 = vmatpush3.msra.mxu0 %v1192_v8  ;;  %959 = vmatprep.subr.mxu1 %v1123_v0 }
  0x2d   :  { %960 = vmatpush3.msra.mxu1 %v1192_v8  ;;  %961 = vmatprep.mubr.msk.f32.mxu1 %vm1124_vm0, %v1123_v0 }
  0x2e   :  { %964 = vmatprep.subr.mxu0 %v1123_v0  ;;  %975 = vmatprep.subr.mxu1 %v1123_v0 }
  0xe4   :  { %v129_v11 = vpop.f32.mrf.mxu0  ;;  %v206_v12 = vpop.f32.mrf.mxu1 }
  0xe5   :  { %v1225_v13 = vadd.f32 %v860_v10, %v129_v11 }
  0xe6   :  { %v930_v14 = vpop.f32.mrf.mxu0  ;;  %v941_v15 = vpop.f32.mrf.mxu1 }
  0xe7   :  { %v210_v16 = vadd.f32 %v206_v12, %v1225_v13 }
  0xe9   :  { %1037 = vtanh.f32 %v210_v16 }
  0xf6   :  { %v1038_v17 = vpop.eup %1037 }
  0xf7   :  { %951 = vmatmul.mubr.msk.f32.vlgmr.msra.gmra.mxu0 %vm59_vm1, %v1038_v17 }
  0xf8   :  { %965 = vmatpush3.msra.mxu0 %v1171_v2  ;;  %972 = vmatprep.mubr.msk.f32.mxu0 %vm1124_vm0, %v1123_v0 }
  0xf9   :  { %966 = vmatprep.subr.mxu0 %v1123_v0 }
  0xfa   :  { %967 = vmatpush3.msra.mxu0 %v1177_v4 }
  0xfb   :  { %968 = vmatprep.subr.mxu0 %v1123_v0 }
  0xfc   :  { %969 = vmatpush3.msra.mxu0 %v1184_v6 }
  0xfd   :  { %970 = vmatprep.subr.mxu0 %v1123_v0 }
  0xfe   :  { %971 = vmatpush3.msra.mxu0 %v1192_v8 }
  0xff   :  { %986 = vmatprep.subr.mxu0 %v1123_v0 }
 0x1b7   :  { %v281_v18 = vpop.f32.mrf.mxu0 }
 0x1b8   :  { %v286_v19 = vrot.slane %v281_v18, 7 }
 0x1b9   :  { %v952_v20 = vpop.f32.mrf.mxu0 }
 0x1ba   :  { %v288_v21 = vadd.f32 %v286_v19, %v1225_v13 }
 0x1bc   :  { %1039 = vtanh.f32 %v288_v21 }
 0x1c9   :  { %v1040_v22 = vpop.eup %1039 }
 0x1ca   :  { %v291_v23 = vrot.slane %v1040_v22, 1 }
 0x1cc   :  { %962 = vmatmul.mubr.msk.f32.vlgmr.msra.gmra.mxu1 %vm59_vm1, %v291_v23 }
 0x1cd   :  { %976 = vmatpush3.msra.mxu1 %v1171_v2  ;;  %983 = vmatprep.mubr.msk.f32.mxu1 %vm1124_vm0, %v1123_v0 }
 0x1ce   :  { %977 = vmatprep.subr.mxu1 %v1123_v0 }
 0x1cf   :  { %978 = vmatpush3.msra.mxu1 %v1177_v4 }
 0x1d0   :  { %979 = vmatprep.subr.mxu1 %v1123_v0 }
 0x1d1   :  { %980 = vmatpush3.msra.mxu1 %v1184_v6 }
 0x1d2   :  { %981 = vmatprep.subr.mxu1 %v1123_v0 }
 0x1d3   :  { %982 = vmatpush3.msra.mxu1 %v1192_v8 }
 0x1d4   :  { %997 = vmatprep.subr.mxu1 %v1123_v0 }
 0x28c   :  { %v360_v24 = vpop.f32.mrf.mxu1 }
 0x28d   :  { %v365_v25 = vrot.slane %v360_v24, 6 }
 0x28e   :  { %v963_v26 = vpop.f32.mrf.mxu1 }
 0x28f   :  { %v367_v27 = vadd.f32 %v365_v25, %v1225_v13 }
 0x291   :  { %1041 = vtanh.f32 %v367_v27 }
 0x29e   :  { %v1042_v28 = vpop.eup %1041 }
 0x29f   :  { %v370_v29 = vrot.slane %v1042_v28, 2 }
 0x2a1   :  { %973 = vmatmul.mubr.msk.f32.vlgmr.msra.gmra.mxu0 %vm59_vm1, %v370_v29 }
 0x2a2   :  { %987 = vmatpush3.msra.mxu0 %v1171_v2  ;;  %994 = vmatprep.mubr.msk.f32.mxu0 %vm1124_vm0, %v1123_v0 }
 0x2a3   :  { %988 = vmatprep.subr.mxu0 %v1123_v0 }
 0x2a4   :  { %989 = vmatpush3.msra.mxu0 %v1177_v4 }
 0x2a5   :  { %990 = vmatprep.subr.mxu0 %v1123_v0 }
 0x2a6   :  { %991 = vmatpush3.msra.mxu0 %v1184_v6 }
 0x2a7   :  { %992 = vmatprep.subr.mxu0 %v1123_v0 }
 0x2a8   :  { %993 = vmatpush3.msra.mxu0 %v1192_v8 }
 0x2a9   :  { %1008 = vmatprep.subr.mxu0 %v1123_v0 }
 0x361   :  { %v439_v30 = vpop.f32.mrf.mxu0 }
 0x362   :  { %v444_v31 = vrot.slane %v439_v30, 5 }
 0x363   :  { %v974_v32 = vpop.f32.mrf.mxu0 }
 0x364   :  { %v446_v33 = vadd.f32 %v444_v31, %v1225_v13 }
 0x366   :  { %1043 = vtanh.f32 %v446_v33 }
 0x373   :  { %v1044_v34 = vpop.eup %1043 }
 0x374   :  { %v449_v35 = vrot.slane %v1044_v34, 3 }
 0x376   :  { %984 = vmatmul.mubr.msk.f32.vlgmr.msra.gmra.mxu1 %vm59_vm1, %v449_v35 }
 0x377   :  { %998 = vmatpush3.msra.mxu1 %v1171_v2  ;;  %1005 = vmatprep.mubr.msk.f32.mxu1 %vm1124_vm0, %v1123_v0 }
 0x378   :  { %999 = vmatprep.subr.mxu1 %v1123_v0 }
 0x379   :  { %1000 = vmatpush3.msra.mxu1 %v1177_v4 }
 0x37a   :  { %1001 = vmatprep.subr.mxu1 %v1123_v0 }
 0x37b   :  { %1002 = vmatpush3.msra.mxu1 %v1184_v6 }
 0x37c   :  { %1003 = vmatprep.subr.mxu1 %v1123_v0 }
 0x37d   :  { %1004 = vmatpush3.msra.mxu1 %v1192_v8 }
 0x37e   :  { %1019 = vmatprep.subr.mxu1 %v1123_v0 }
 0x436   :  { %v518_v36 = vpop.f32.mrf.mxu1 }
 0x437   :  { %v523_v37 = vrot.slane %v518_v36, 4 }
 0x438   :  { %v985_v38 = vpop.f32.mrf.mxu1 }
 0x439   :  { %v525_v39 = vadd.f32 %v523_v37, %v1225_v13 }
 0x43b   :  { %1045 = vtanh.f32 %v525_v39 }
 0x448   :  { %v1046_v40 = vpop.eup %1045 }
 0x449   :  { %v528_v41 = vrot.slane %v1046_v40, 4 }
 0x44b   :  { %995 = vmatmul.mubr.msk.f32.vlgmr.msra.gmra.mxu0 %vm59_vm1, %v528_v41 }
 0x44c   :  { %1009 = vmatpush3.msra.mxu0 %v1171_v2  ;;  %1016 = vmatprep.mubr.msk.f32.mxu0 %vm1124_vm0, %v1123_v0 }
 0x44d   :  { %1010 = vmatprep.subr.mxu0 %v1123_v0 }
 0x44e   :  { %1011 = vmatpush3.msra.mxu0 %v1177_v4 }
 0x44f   :  { %1012 = vmatprep.subr.mxu0 %v1123_v0 }
 0x450   :  { %1013 = vmatpush3.msra.mxu0 %v1184_v6 }
 0x451   :  { %1014 = vmatprep.subr.mxu0 %v1123_v0 }
 0x452   :  { %1015 = vmatpush3.msra.mxu0 %v1192_v8 }
 0x50b   :  { %v597_v42 = vpop.f32.mrf.mxu0 }
 0x50c   :  { %v602_v43 = vrot.slane %v597_v42, 3 }
 0x50d   :  { %v996_v44 = vpop.f32.mrf.mxu0 }
 0x50e   :  { %v604_v45 = vadd.f32 %v602_v43, %v1225_v13 }
 0x510   :  { %1047 = vtanh.f32 %v604_v45 }
 0x51d   :  { %v1048_v46 = vpop.eup %1047 }
 0x51e   :  { %v607_v47 = vrot.slane %v1048_v46, 5 }
 0x520   :  { %1006 = vmatmul.mubr.msk.f32.vlgmr.msra.gmra.mxu1 %vm59_vm1, %v607_v47 }
 0x521   :  { %1027 = vmatprep.mubr.msk.f32.mxu1 %vm1124_vm0, %v1123_v0  ;;  %1020 = vmatpush3.msra.mxu1 %v767_v54 }
 0x522   :  { %1021 = vmatprep.subr.mxu1 %v1123_v0 }
 0x523   :  { %1022 = vmatpush3.msra.mxu1 %v766_v55 }
 0x524   :  { %1023 = vmatprep.subr.mxu1 %v1123_v0 }
 0x525   :  { %1024 = vmatpush3.msra.mxu1 %v765_v56 }
 0x526   :  { %1025 = vmatprep.subr.mxu1 %v1123_v0 }
 0x527   :  { %1026 = vmatpush3.msra.mxu1 %v764_v57 }
 0x5e0   :  { %v676_v48 = vpop.f32.mrf.mxu1 }
 0x5e1   :  { %v681_v49 = vrot.slane %v676_v48, 2 }
 0x5e2   :  { %v1007_v50 = vpop.f32.mrf.mxu1 }
 0x5e3   :  { %v683_v51 = vadd.f32 %v681_v49, %v1225_v13 }
 0x5e5   :  { %1049 = vtanh.f32 %v683_v51 }
 0x5f2   :  { %v1050_v52 = vpop.eup %1049 }
 0x5f3   :  { %v686_v53 = vrot.slane %v1050_v52, 6 }
 0x5f5   :  { %1017 = vmatmul.mubr.msk.f32.vlgmr.msra.gmra.mxu0 %vm59_vm1, %v686_v53 }
 0x6b5   :  { %v755_v58 = vpop.f32.mrf.mxu0 }
 0x6b6   :  { %v760_v59 = vrot.slane %v755_v58, 1 }
 0x6b7   :  { %v1018_v60 = vpop.f32.mrf.mxu0 }
 0x6b8   :  { %v762_v61 = vadd.f32 %v760_v59, %v1225_v13 }
 0x6ba   :  { %1051 = vtanh.f32 %v762_v61 }
 0x6c7   :  { %v1052_v62 = vpop.eup %1051 }
 0x6c8   :  { %v769_v63 = vrot.slane %v1052_v62, 7 }
 0x6ca   :  { %1028 = vmatmul.mubr.msk.f32.vlgmr.msra.gmra.mxu1 %vm59_vm1, %v769_v63 }
 0x78a   :  { %v838_v0 = vpop.f32.mrf.mxu1 }
 0x78b   :  { %843 = vst.msk [vmem:[#allocation7] sm:$0x1] %vm842_vm2, %v838_v0 }
 0x78c   :  { %v1029_v1 = vpop.f32.mrf.mxu1 }
 0x78d   :  { %1104 = shalt.err (!%p1101_p0)
}
 0x78e   :  { %853 = dma.vmem_to_hbm [thread:$0]  %s851_s20, 16, %s1317_s5, [#allocation4]  }
 0x78f   :  { %1117 = dma.done.wait [#allocation4], 16  }
 0x790   :  { %1118 = vsyncadd [#allocation4], 4294967280 }
 0x791   :  { %857 = vsyncpa [#allocation3], 1 }
 0x792   :  { %858 = vsyncpa [#allocation6], 1 }
 0x793   :  { %859 = vsyncpa [#allocation4], 1 }

</bundles_post_ra>
